<compile_context>
chip_gen: v5e
topology: v5e:2x2
jax: 0.10.0
libtpu: 0.0.40
codegen_flags: <defaults>
</compile_context>

<pallas_src>
import functools

import jax
import jax.numpy as jnp
import numpy as np
from jax import lax
from jax.experimental import pallas as pl
from jax.experimental.pallas import tpu as pltpu


def elsr_x2_kernel(H, W, roll_sign, x_ref, w1_ref, b1_ref, wb1_ref, bb1_ref,
                   prelu_ref, wb2_ref, bb2_ref, wl_ref, bl_ref, out_ref):
    """Fused conv1 -> bottleneck(conv, PReLU, conv) -> +residual -> last_conv.

    Activations are (8, Lp) f32: 8 channel slots on sublanes, flattened padded
    spatial H*(W+2) on lanes, lane-padded to Lp (multiple of 128, >= L + W+2).
    Width-pad columns and the lane tail are kept at exactly zero, so circular
    rolls reproduce the 3x3 "same" zero padding on every image column; the
    only lanes that pick up wrapped garbage are pad/tail lanes, which are
    masked before reuse (and stripped by the wrapper at the end).
    """
    Wp = W + 2                    # width incl. 1-px zero pad on each side
    L = H * Wp                    # valid flattened spatial extent
    Lp = x_ref.shape[-1]          # lane-padded extent (>= L + Wp, mult. of 128)

    lane = lax.broadcasted_iota(jnp.int32, (1, Lp), 1)
    col = lane % Wp
    # 1.0 on real image columns, 0.0 on width-pad columns and the lane tail.
    col_mask = (jnp.logical_and(col >= 1, col <= W)
                & (lane < L)).astype(jnp.float32)

    def jroll(v, shift):
        # jnp.roll semantics independent of pltpu.roll's rotation convention.
        return pltpu.roll(v, (roll_sign * shift) % Lp, axis=1)

    def conv3x3(act, w_ref, b_ref):
        # act: (8, Lp) f32 with zero pad columns and zero lane tail.
        rows = (jroll(act, Wp), act, jroll(act, -Wp))        # dy = -1, 0, +1
        acc = None
        for dy in range(3):
            row = rows[dy]
            for dx in range(3):
                tap = row if dx == 1 else jroll(row, 1 - dx)  # dx = -1, 0, +1
                part = jnp.dot(w_ref[dy * 3 + dx], tap,
                               preferred_element_type=jnp.float32)
                acc = part if acc is None else acc + part
        return acc + b_ref[...]                               # (cout, Lp) f32

    # conv1: 3 -> 6 (channel slots padded to 8; pad slots stay exactly zero)
    c1 = conv3x3(x_ref[...], w1_ref, b1_ref)

    # bottleneck conv a: 6 -> 6, then PReLU (single shared scalar from SMEM)
    t = conv3x3(c1 * col_mask, wb1_ref, bb1_ref)
    a = prelu_ref[0, 0]
    t = jnp.maximum(t, 0.0) + a * jnp.minimum(t, 0.0)

    # bottleneck conv b: 6 -> 6, residual add with conv1 output
    t = conv3x3(t * col_mask, wb2_ref, bb2_ref)
    res = t + c1

    # last_conv: 6 -> 12 (pad columns / lane tail are stripped by the wrapper)
    out_ref[...] = conv3x3(res * col_mask, wl_ref, bl_ref).astype(out_ref.dtype)


def _prep_weight(w_hwio, cout_pad):
    """(3, 3, cin, cout) HWIO -> (9, cout_pad, 8): one (cout, cin) matrix per
    tap, channel slots zero-padded (padded rows/cols contribute exactly 0)."""
    kh, kw, cin, cout = w_hwio.shape
    wp = jnp.zeros((kh, kw, 8, cout_pad), w_hwio.dtype)
    wp = wp.at[:, :, :cin, :cout].set(w_hwio)
    return jnp.transpose(wp, (0, 1, 3, 2)).reshape(kh * kw, cout_pad, 8)


def _prep_bias(b, cout_pad):
    return jnp.zeros((cout_pad, 1), b.dtype).at[:b.shape[-1], 0].set(b.reshape(-1))


_ROLL_SIGN = None


def _roll_sign():
    """Detect pltpu.roll's rotation convention (vs jnp.roll) once."""
    global _ROLL_SIGN
    if _ROLL_SIGN is None:
        def probe(x_ref, o_ref):
            o_ref[...] = pltpu.roll(x_ref[...], 1, axis=1)

        x = jnp.arange(8 * 128, dtype=jnp.float32).reshape(8, 128)
        y = np.asarray(jax.block_until_ready(pl.pallas_call(
            probe, out_shape=jax.ShapeDtypeStruct((8, 128), jnp.float32))(x)))
        xh = np.asarray(x)
        if np.array_equal(y, np.roll(xh, 1, axis=1)):
            _ROLL_SIGN = 1
        elif np.array_equal(y, np.roll(xh, -1, axis=1)):
            _ROLL_SIGN = -1
        else:
            raise RuntimeError("unexpected pltpu.roll semantics")
    return _ROLL_SIGN


def elsr_x2_forward(x_nchw, params):
    """x_nchw: (N, 3, H, W) float32 -> (N, 3, 2H, 2W) float32."""
    N, C, H, W = x_nchw.shape
    assert C == 3
    Wp = W + 2
    L = H * Wp
    Lp = ((L + Wp + 2 + 127) // 128) * 128   # lane pad: >= Wp zero tail, 128-aligned
    (w1, b1, wb1, bb1, prelu_a, wb2, bb2, wl, bl) = params

    w1m = _prep_weight(w1, 8)
    wb1m = _prep_weight(wb1, 8)
    wb2m = _prep_weight(wb2, 8)
    wlm = _prep_weight(wl, 12)
    b1c = _prep_bias(b1, 8)
    bb1c = _prep_bias(bb1, 8)
    bb2c = _prep_bias(bb2, 8)
    blc = _prep_bias(bl, 12)

    # Channel pad 3 -> 8, zero-pad width by one column each side, flatten the
    # spatial axes onto lanes, lane-pad L -> Lp (all padding is zero).
    xp = jnp.pad(x_nchw, ((0, 0), (0, 5), (0, 0), (1, 1))).reshape(N, 8, L)
    xp = jnp.pad(xp, ((0, 0), (0, 0), (0, Lp - L)))

    roll_sign = _roll_sign()

    out = pl.pallas_call(
        functools.partial(elsr_x2_kernel, H, W, roll_sign),
        out_shape=jax.ShapeDtypeStruct((N, 12, Lp), jnp.float32),
        grid=(N,),
        in_specs=[
            pl.BlockSpec((pl.Squeezed(), 8, Lp), lambda n: (n, 0, 0)),   # x
            pl.BlockSpec((9, 8, 8), lambda n: (0, 0, 0)),                # w1
            pl.BlockSpec((8, 1), lambda n: (0, 0)),                      # b1
            pl.BlockSpec((9, 8, 8), lambda n: (0, 0, 0)),                # wb1
            pl.BlockSpec((8, 1), lambda n: (0, 0)),                      # bb1
            pl.BlockSpec(memory_space=pltpu.MemorySpace.SMEM),           # PReLU a
            pl.BlockSpec((9, 8, 8), lambda n: (0, 0, 0)),                # wb2
            pl.BlockSpec((8, 1), lambda n: (0, 0)),                      # bb2
            pl.BlockSpec((9, 12, 8), lambda n: (0, 0, 0)),               # wl
            pl.BlockSpec((12, 1), lambda n: (0, 0)),                     # bl
        ],
        out_specs=pl.BlockSpec((pl.Squeezed(), 12, Lp), lambda n: (n, 0, 0)),
        compiler_params=pltpu.CompilerParams(
            dimension_semantics=("parallel",)),
    )(xp, w1m, b1c, wb1m, bb1c, prelu_a, wb2m, bb2c, wlm, blc)

    # Strip lane tail + width-pad columns, then PixelShuffle(2):
    # channel k = 4*c + 2*i + j  ->  out[n, c, 2h+i, 2w+j]
    o = out[:, :, :L].reshape(N, 3, 2, 2, H, Wp)[..., 1:W + 1]
    o = jnp.transpose(o, (0, 1, 4, 2, 5, 3))
    return o.reshape(N, 3, 2 * H, 2 * W)


def elsr_x2_reference(x_nchw, params):
    """Pure-JAX reference matching the PyTorch module semantics."""
    (w1, b1, wb1, bb1, prelu_a, wb2, bb2, wl, bl) = params

    def conv(x, w_hwio, b):
        y = lax.conv_general_dilated(
            x, w_hwio, window_strides=(1, 1), padding=((1, 1), (1, 1)),
            dimension_numbers=('NCHW', 'HWIO', 'NCHW'),
            precision=lax.Precision.HIGHEST)
        return y + b.reshape(1, -1, 1, 1)

    c1 = conv(x_nchw, w1, b1)
    bn = conv(c1, wb1, bb1)
    a = prelu_a[0, 0]
    bn = jnp.maximum(bn, 0.0) + a * jnp.minimum(bn, 0.0)
    bn = conv(bn, wb2, bb2)
    r = bn + c1
    y = conv(r, wl, bl)
    N, _, H, W = y.shape
    y = y.reshape(N, 3, 2, 2, H, W)
    y = jnp.transpose(y, (0, 1, 4, 2, 5, 3))
    return y.reshape(N, 3, 2 * H, 2 * W)


if __name__ == "__main__":
    key = jax.random.PRNGKey(0)
    ks = jax.random.split(key, 10)

    N, H, W = 2, 16, 16
    x = jax.random.normal(ks[0], (N, 3, H, W), jnp.float32)

    s = 0.1
    w1 = jax.random.normal(ks[1], (3, 3, 3, 6), jnp.float32) * s
    b1 = jax.random.normal(ks[2], (1, 6), jnp.float32) * s
    wb1 = jax.random.normal(ks[3], (3, 3, 6, 6), jnp.float32) * s
    bb1 = jax.random.normal(ks[4], (1, 6), jnp.float32) * s
    prelu_a = jnp.full((1, 1), 0.25, jnp.float32)   # torch nn.PReLU() default
    wb2 = jax.random.normal(ks[5], (3, 3, 6, 6), jnp.float32) * s
    bb2 = jax.random.normal(ks[6], (1, 6), jnp.float32) * s
    wl = jax.random.normal(ks[7], (3, 3, 6, 12), jnp.float32) * s
    bl = jax.random.normal(ks[8], (1, 12), jnp.float32) * s
    params = (w1, b1, wb1, bb1, prelu_a, wb2, bb2, wl, bl)

    y = elsr_x2_forward(x, params)
    y = jax.block_until_ready(y)
    assert y.shape == (N, 3, 2 * H, 2 * W), y.shape

    # Reference is exact f32; the kernel uses default (single-pass bf16-input)
    # MXU precision, hence the loosened tolerance.
    y_ref = elsr_x2_reference(x, params)
    np.testing.assert_allclose(np.asarray(y), np.asarray(y_ref),
                               rtol=3e-2, atol=3e-2)
    print("KERNEL_OK")
</pallas_src>

<mosaic_0001>
module attributes {stable_mosaic.version = 11 : i64} {
  func.func @probe(%arg0: memref<8x128xf32, #tpu.memory_space<vmem>>, %arg1: memref<8x128xf32, #tpu.memory_space<vmem>>) attributes {dimension_semantics = [], scalar_prefetch = 0 : i64, scratch_operands = 0 : i64, tpu.core_type = #tpu.core_type<tc>} {
    %c0 = arith.constant 0 : index
    %c0_0 = arith.constant 0 : index
    %0 = vector.load %arg0[%c0, %c0_0] : memref<8x128xf32, #tpu.memory_space<vmem>>, vector<8x128xf32>
    %c1_i32 = arith.constant 1 : i32
    %1 = tpu.dynamic_rotate %0 by %c1_i32 dim 1 : vector<8x128xf32>, i32 -> vector<8x128xf32>
    %c0_1 = arith.constant 0 : index
    %c0_2 = arith.constant 0 : index
    %2 = vector.load %arg1[%c0_1, %c0_2] : memref<8x128xf32, #tpu.memory_space<vmem>>, vector<8x128xf32>
    tpu.vector_store %arg1[%c0_1, %c0_2], %1 {strides = array<i32>} : memref<8x128xf32, #tpu.memory_space<vmem>>, vector<8x128xf32>,
    return
  }
}

</mosaic_0001>

<bundles_post_ra>
// kernel: tpu_custom_call.1
= control target key start
LH: loop header
LB: loop body
LE: loop exit
PB: predicated region body
PF: predicated region fallthrough
CT: control target
= control target key end

     0   :  { %6 = vsyncpa [#allocation3], 0  ;;  %s118_s0 = inlined_call_operand.hbm [shape: f32[8,128], index: 0, kind: input, shape index: {}]   ;;  %s119_s1 = inlined_call_operand.hbm [shape: f32[8,128], index: 1, kind: output, shape index: {}]  }
   0x1   :  { %7 = vsyncpa [#allocation4], 0  ;;  %s13_s8 = sshll.u32 %s118_s0, 4  ;;  %s99_s9 = smov [#allocation2]   ;;  %s14_s8 = int_to_ptr.hbm [resolvable:$true] %s13_s8 }
   0x2   :  { %s15_s10 = sshll.u32 %s99_s9, 4  ;;  %s16_s10 = int_to_ptr.vmem [resolvable:$true] %s15_s10 }
   0x3   :  { %18 = dma.hbm_to_vmem [thread:$0]  %s14_s8, 128, %s16_s10, [#allocation3]  }
   0x4   :  { %95 = dma.done.wait [#allocation3], 128  }
   0x5   :  { %96 = vsyncadd [#allocation3], 4294967168  ;;  %v23_v0 = vld [vmem:[#allocation2] sm:$0xff]  ;;  %s100_s11 = smov 1   ;;  %s101_s12 = smov [#allocation5]  }
   0x6   :  { %24 = vrot.lane.b32.xlu0 %v23_v0, %s100_s11  ;;  %s32_s13 = sshll.u32 %s101_s12, 4  ;;  %s34_s16 = sshll.u32 %s119_s1, 4  ;;  %s33_s13 = int_to_ptr.vmem [resolvable:$true] %s32_s13  ;;  %s35_s16 = int_to_ptr.hbm [resolvable:$true] %s34_s16 }
  0x78   :  { %v25_v1 = vpop.permute.xlu0 %24 }
  0x79   :  { %26 = vst [vmem:[#allocation5] sm:$0xff] %v25_v1 }
  0x7a   :  { %37 = dma.vmem_to_hbm [thread:$0]  %s33_s13, 128, %s35_s16, [#allocation4]  }
  0x7b   :  { %97 = dma.done.wait [#allocation4], 128  }
  0x7c   :  { %98 = vsyncadd [#allocation4], 4294967168 }
  0x7d   :  { %42 = vsyncpa [#allocation3], 1 }
  0x7e   :  { %43 = vsyncpa [#allocation4], 1 }

</bundles_post_ra>
